<compile_context>
chip_gen: v7x
topology: tpu7x:2x2x1
jax: 0.10.0
libtpu: 0.0.40
codegen_flags: <defaults>
</compile_context>

<pallas_src>
import dataclasses

import jax
import jax.numpy as jnp
from jax import lax
from jax.experimental import pallas as pl
from jax.experimental.pallas import tpu as pltpu

LANE = 128
_MAX_UNROLL_CHUNKS = 64          # bound on statically unrolled 128-lane accumulator adds
_MMD_MAX_TK = 4096               # K-tile width for the MMD Gram accumulation


def _round_up(a, b):
    return -(-a // b) * b


def _vmem_limit_bytes():
    # generation-aware scoped-VMEM limit: ~75% of physical capacity (128 MiB on v5e/v6e,
    # 64 MiB on v7x), capped so XLA keeps headroom for its own buffers.
    try:
        cap = int(pltpu.get_tpu_info().vmem_capacity_bytes)
    except Exception:
        cap = 64 * 1024 * 1024
    return max(16 * 1024 * 1024, min(cap * 3 // 4, 100 * 1024 * 1024))


_VMEM_LIMIT = _vmem_limit_bytes()


def _stable_softplus(x):
    # softplus(x) = max(x, 0) + log(1 + exp(-|x|))   (numerically stable)
    return jnp.maximum(x, 0.0) + jnp.log(1.0 + jnp.exp(-jnp.abs(x)))


def _feat_tiling(feat, batch, target_bytes=2 << 20):
    """(tk, f_pad): imgs/rec_imgs/disc-w are streamed in (batch, tk) tiles.  Single
    full-extent step (no padding, no copies) whenever the whole feature dim fits in a
    ~2 MiB block; otherwise 128-aligned ~2 MiB tiles (tiny zero-pad of the tail only)."""
    lanes = max(LANE, (target_bytes // (4 * max(batch, 1))) // LANE * LANE)
    if feat <= lanes:
        return feat, feat
    return lanes, _round_up(feat, lanes)


def _lane_accumulate(acc_ref, prod, chunks, rem, chunked):
    # accumulate a (B, tk) elementwise product into a (B, LANE) accumulator; the single
    # cross-lane reduce is deferred to the finalize step when `chunked`.
    if chunked:
        for j in range(chunks):
            acc_ref[...] += prod[:, j * LANE:(j + 1) * LANE]
        if rem:
            acc_ref[:, 0:1] += jnp.sum(prod[:, chunks * LANE:], axis=1, keepdims=True)
    else:
        acc_ref[:, 0:1] += jnp.sum(prod, axis=1, keepdims=True)


# ---------------- fused generator-path kernel: rec + perc + disc GEMV + adv head ----------------

def _make_gen_kernel(rec_mode, disc_mode, batch, feat, tk, wave_numels):
    inv_img = 1.0 / float(batch * feat)
    inv_wave = tuple(1.0 / float(n) for n in wave_numels)
    chunks, rem = divmod(tk, LANE)
    chunked = 0 < chunks <= _MAX_UNROLL_CHUNKS

    def rec_err(d):
        if rec_mode == "l1":
            return jnp.abs(d)
        if rec_mode == "l2":
            return d * d
        # focal_freq_loss, alpha=1: clamp(sqrt(d^2), 0, 1) * d^2 == min(|d|, 1) * d^2
        return jnp.minimum(jnp.abs(d), 1.0) * (d * d)

    def kernel(wx1, wr1, wx2, wr2, wx3, wr3, wx4, wr4,
               img_ref, rimg_ref, w_ref, b_ref,
               o_ref, rec_acc, perc_acc, logit_acc):
        k = pl.program_id(0)

        @pl.when(k == 0)
        def _init():
            perc_acc[...] = jnp.zeros_like(perc_acc)
            logit_acc[...] = jnp.zeros_like(logit_acc)
            # 4 reconstruction pairs, each fetched once (constant index_map), sum of means
            rec = jnp.float32(0.0)
            for (a, b, inv_n) in ((wx1, wr1, inv_wave[0]), (wx2, wr2, inv_wave[1]),
                                  (wx3, wr3, inv_wave[2]), (wx4, wr4, inv_wave[3])):
                d = a[...].astype(jnp.float32) - b[...].astype(jnp.float32)
                rec = rec + jnp.sum(rec_err(d)) * inv_n
            rec_acc[...] = rec.reshape(1, 1)

        xi = img_ref[...].astype(jnp.float32)
        ri = rimg_ref[...].astype(jnp.float32)
        d = xi - ri
        perc_acc[...] += (jnp.sum(d * d) * inv_img).reshape(1, 1)
        _lane_accumulate(logit_acc, ri * w_ref[...], chunks, rem, chunked)

        @pl.when(k == pl.num_programs(0) - 1)
        def _fin():
            logits = jnp.sum(logit_acc[...], axis=1, keepdims=True) + b_ref[0]   # (B, 1)
            if disc_mode == "hinge":
                adv = -jnp.mean(logits)                   # -mean(logits_fake)
            else:                                          # BCE-with-logits vs all-ones
                adv = jnp.mean(_stable_softplus(-logits))
            o_ref[...] = jnp.zeros_like(o_ref)
            o_ref[:, 0:1] = rec_acc[...]
            o_ref[:, 1:2] = perc_acc[...]
            o_ref[:, 2:3] = adv.reshape(1, 1)

    return kernel


# ---------------- fused discriminator-path kernel: 2x GEMV + hinge/CE loss + logit means ----------------

def _make_disc_kernel(disc_mode, tk):
    chunks, rem = divmod(tk, LANE)
    chunked = 0 < chunks <= _MAX_UNROLL_CHUNKS

    def kernel(xr_ref, xf_ref, w_ref, b_ref, o_ref, racc, facc):
        k = pl.program_id(0)

        @pl.when(k == 0)
        def _init():
            racc[...] = jnp.zeros_like(racc)
            facc[...] = jnp.zeros_like(facc)

        w = w_ref[...]
        _lane_accumulate(racc, xr_ref[...].astype(jnp.float32) * w, chunks, rem, chunked)
        _lane_accumulate(facc, xf_ref[...].astype(jnp.float32) * w, chunks, rem, chunked)

        @pl.when(k == pl.num_programs(0) - 1)
        def _fin():
            lr = jnp.sum(racc[...], axis=1, keepdims=True) + b_ref[0]   # logits_real (B,1)
            lf = jnp.sum(facc[...], axis=1, keepdims=True) + b_ref[0]   # logits_fake (B,1)
            if disc_mode == "hinge":
                loss = 0.5 * (jnp.mean(jnp.maximum(1.0 - lr, 0.0))
                              + jnp.mean(jnp.maximum(1.0 + lf, 0.0)))
            else:  # cross_entropy: real labels=1 -> softplus(-x); fake labels=0 -> softplus(x)
                loss = 0.5 * (jnp.mean(_stable_softplus(-lr))
                              + jnp.mean(_stable_softplus(lf)))
            o_ref[...] = jnp.zeros_like(o_ref)
            o_ref[:, 0:1] = loss.reshape(1, 1)
            o_ref[:, 1:2] = jnp.mean(lr).reshape(1, 1)
            o_ref[:, 2:3] = jnp.mean(lf).reshape(1, 1)

    return kernel


# ---------------- MMD: K-tiled Gram accumulation, single signed-mask reduction ----------------

def _make_mmd_kernel(n, d_true):
    inv_dim2 = 1.0 / float(d_true * d_true)
    inv_n2 = 1.0 / float(n * n)
    m = 2 * n

    def kernel(z_ref, o_ref, g_acc, rn_acc, cn_acc):
        k = pl.program_id(0)

        @pl.when(k == 0)
        def _init():
            g_acc[...] = jnp.zeros_like(g_acc)
            rn_acc[...] = jnp.zeros_like(rn_acc)
            cn_acc[...] = jnp.zeros_like(cn_acc)

        z = z_ref[...].astype(jnp.float32)          # (2n, tk); rows [0,n)=true_f, [n,2n)=f
        g_acc[...] += lax.dot_general(z, z, (((1,), (1,)), ((), ())),
                                      preferred_element_type=jnp.float32)
        zz = z * z
        rn_acc[...] += jnp.sum(zz, axis=1, keepdims=True)                         # (m, 1)
        cn_acc[...] += lax.dot_general(jnp.ones((1, z.shape[1]), jnp.float32), zz,
                                       (((1,), (1,)), ((), ())),
                                       preferred_element_type=jnp.float32)        # (1, m)

        @pl.when(k == pl.num_programs(0) - 1)
        def _fin():
            d2 = jnp.maximum(rn_acc[...] + cn_acc[...] - 2.0 * g_acc[...], 0.0)
            kmat = jnp.exp(-d2 * inv_dim2)
            r = lax.broadcasted_iota(jnp.int32, (m, m), 0)
            c = lax.broadcasted_iota(jnp.int32, (m, m), 1)
            sign = jnp.where((r < n) == (c < n), 1.0, -1.0)   # +Kxx,+Kyy ; -Kxy,-Kyx
            o_ref[...] = (jnp.sum(sign * kmat) * inv_n2).reshape(1, 1)

    return kernel


def mmd_loss(f, key):
    f2 = jnp.asarray(f, jnp.float32).reshape(f.shape[0], -1)
    n, d = int(f2.shape[0]), int(f2.shape[1])
    # TODO(synk): torch.randn_like drawn wrapper-side (in-kernel Box-Muller needs sin/cos,
    #   which Mosaic does not lower); stacked so one kernel handles Kxx/Kyy/Kxy.
    true_f = jax.random.normal(key, (n, d), dtype=jnp.float32)
    z = jnp.concatenate([true_f, f2], axis=0)                       # (2n, d)
    if d <= _MMD_MAX_TK:
        tk, d_pad = d, d
    else:
        tk = _MMD_MAX_TK
        d_pad = _round_up(d, tk)
        z = jnp.pad(z, ((0, 0), (0, d_pad - d)))                    # zero cols cancel in dists
    out = pl.pallas_call(
        _make_mmd_kernel(n, d),
        grid=(d_pad // tk,),
        in_specs=[pl.BlockSpec((2 * n, tk), lambda k: (0, k))],
        out_specs=pl.BlockSpec((1, 1), lambda k: (0, 0)),
        out_shape=jax.ShapeDtypeStruct((1, 1), jnp.float32),
        scratch_shapes=[pltpu.VMEM((2 * n, 2 * n), jnp.float32),
                        pltpu.VMEM((2 * n, 1), jnp.float32),
                        pltpu.VMEM((1, 2 * n), jnp.float32)],
        compiler_params=pltpu.CompilerParams(
            dimension_semantics=("arbitrary",),
            vmem_limit_bytes=_VMEM_LIMIT),
    )(z)
    return out[0, 0]


# ----------------------------- Loss module -----------------------------

@dataclasses.dataclass
class Args:
    rec_loss_fn: str = "focal"
    disc_loss_fn: str = "hinge"
    out_channels: int = 64
    n_layers: int = 2
    lc: float = 1.0
    lp: float = 0.1
    ld: float = 0.5
    disc_start_ep: int = 0


class PallasLoss:
    def __init__(self, args, steps_per_epoch, img_shape, key):
        assert args.rec_loss_fn in ("l1", "l2", "focal")
        assert args.disc_loss_fn in ("hinge", "cross_entropy")
        self.args = args
        self.disc_start_step = args.disc_start_ep * steps_per_epoch

        b, c, h, w = img_shape
        self.batch = b
        self.feat = c * h * w
        self.tk, self.f_pad = _feat_tiling(self.feat, b)

        # TODO(synk): DiscriminatorHL/DiscriminatorCEL (conv PatchGAN) are not defined in
        #   the source module; a deterministic linear discriminator (weights_init-style
        #   N(0, 0.02)) stands in.
        w_row = 0.02 * jax.random.normal(key, (1, self.feat), dtype=jnp.float32)
        if self.f_pad > self.feat:
            w_row = jnp.pad(w_row, ((0, 0), (0, self.f_pad - self.feat)))
        self.disc_w = w_row
        self.disc_b = jnp.zeros((1,), dtype=jnp.float32)
        # TODO(synk): LPIPS needs pretrained vgg16_lpips.pth weights; the perceptual loss
        #   is approximated by an image-space MSE fused into the generator kernel.

    def _flat_img(self, a):
        x = jnp.asarray(a).reshape(a.shape[0], -1)   # free reshape; dtype preserved (bf16 ok)
        if self.f_pad > x.shape[1]:
            x = jnp.pad(x, ((0, 0), (0, self.f_pad - x.shape[1])))
        return x

    def _gen_losses(self, wave_pairs, imgs, rec_imgs):
        wave_flat, wave_numels, wave_specs = [], [], []
        for x, y in wave_pairs:
            xf = jnp.asarray(x).reshape(x.shape[0], -1)
            yf = jnp.asarray(y).reshape(y.shape[0], -1)
            wave_flat += [xf, yf]
            wave_numels.append(int(xf.shape[0]) * int(xf.shape[1]))
            spec = pl.BlockSpec(tuple(xf.shape), lambda k: (0, 0))   # fetched once
            wave_specs += [spec, spec]
        b, tk = self.batch, self.tk
        kernel = _make_gen_kernel(self.args.rec_loss_fn, self.args.disc_loss_fn,
                                  b, self.feat, tk, wave_numels)
        out = pl.pallas_call(
            kernel,
            grid=(self.f_pad // tk,),
            in_specs=wave_specs + [
                pl.BlockSpec((b, tk), lambda k: (0, k)),
                pl.BlockSpec((b, tk), lambda k: (0, k)),
                pl.BlockSpec((1, tk), lambda k: (0, k)),
                pl.BlockSpec(memory_space=pltpu.MemorySpace.SMEM)],
            out_specs=pl.BlockSpec((1, 8), lambda k: (0, 0)),
            out_shape=jax.ShapeDtypeStruct((1, 8), jnp.float32),
            scratch_shapes=[pltpu.VMEM((1, 1), jnp.float32),     # rec accumulator
                            pltpu.VMEM((1, 1), jnp.float32),     # perc accumulator
                            pltpu.VMEM((b, LANE), jnp.float32)], # lane-wide logit acc
            compiler_params=pltpu.CompilerParams(
                # single-TC reduction grid; on v7x a CORE_PARALLEL shard axis would engage
                # the 2nd TensorCore -- omitted for portability across v5e/v6e/v7x.
                dimension_semantics=("arbitrary",),
                vmem_limit_bytes=_VMEM_LIMIT),
        )(*wave_flat, self._flat_img(imgs), self._flat_img(rec_imgs),
          self.disc_w, self.disc_b)
        return out[0, 0], out[0, 1], out[0, 2]

    def _disc_losses(self, imgs, rec_imgs):
        b, tk = self.batch, self.tk
        kernel = _make_disc_kernel(self.args.disc_loss_fn, tk)
        out = pl.pallas_call(
            kernel,
            grid=(self.f_pad // tk,),
            in_specs=[pl.BlockSpec((b, tk), lambda k: (0, k)),
                      pl.BlockSpec((b, tk), lambda k: (0, k)),
                      pl.BlockSpec((1, tk), lambda k: (0, k)),
                      pl.BlockSpec(memory_space=pltpu.MemorySpace.SMEM)],
            out_specs=pl.BlockSpec((1, 8), lambda k: (0, 0)),
            out_shape=jax.ShapeDtypeStruct((1, 8), jnp.float32),
            scratch_shapes=[pltpu.VMEM((b, LANE), jnp.float32),
                            pltpu.VMEM((b, LANE), jnp.float32)],
            compiler_params=pltpu.CompilerParams(
                dimension_semantics=("arbitrary",),
                vmem_limit_bytes=_VMEM_LIMIT),
        )(self._flat_img(imgs), self._flat_img(rec_imgs), self.disc_w, self.disc_b)
        return out[0, 0], out[0, 1], out[0, 2]

    def forward(self, imgs, yh1_norm, yh2_norm, yl_norm, yh1_,
                rec_imgs, rec_yh1_norm, rec_yh2_norm, rec_yl_norm, rec_yh1_,
                f, vq_loss, optimizer_idx, last_layer, global_step, split):
        args = self.args
        # jit-safe gate (works for python ints and traced global_step)
        gate = jnp.where(jnp.asarray(global_step) >= self.disc_start_step,
                         jnp.float32(1.0), jnp.float32(0.0))

        if optimizer_idx == 0:
            wave_pairs = [(yh1_norm, rec_yh1_norm), (yh2_norm, rec_yh2_norm),
                          (yl_norm, rec_yl_norm), (yh1_, rec_yh1_)]
            rec_loss, perc_loss, disc_loss = self._gen_losses(wave_pairs, imgs, rec_imgs)
            # TODO(synk): calculate_adaptive_weight needs autograd through the generator's
            #   last layer (no graph in this synthetic setup); eval-path weight = 1.0.
            weight = jnp.float32(1.0)
            disc_loss = disc_loss * gate
            vae_loss = (rec_loss + args.lc * vq_loss + args.lp * perc_loss
                        + weight * args.ld * disc_loss)
            vae_log = {
                f"{split}_vae_loss": vae_loss,
                f"{split}_vae_rec_loss": rec_loss,
                f"{split}_vae_vq_loss": args.lc * vq_loss,
                f"{split}_vae_perc_loss": args.lp * perc_loss,
                f"{split}_vae_disc_loss": args.ld * disc_loss,
                f"{split}_vae_disc_weight": weight,
            }
            return vae_loss, vae_log

        if optimizer_idx == 1:
            disc_loss, logits_real, logits_fake = self._disc_losses(imgs, rec_imgs)
            disc_loss = disc_loss * gate
            disc_log = {
                f"{split}_disc_loss": disc_loss,
                f"{split}_logits_real": logits_real,
                f"{split}_logits_fake": logits_fake,
            }
            return disc_loss, disc_log


# ----------------------------- demo -----------------------------

if __name__ == "__main__":
    key = jax.random.PRNGKey(0)
    ks = jax.random.split(key, 16)
    B, C, H, W = 2, 3, 16, 16

    imgs = jax.random.normal(ks[0], (B, C, H, W), jnp.float32)
    rec_imgs = jax.random.normal(ks[1], (B, C, H, W), jnp.float32)
    yh1_norm = jax.random.normal(ks[2], (B, 9, 8, 8), jnp.float32)
    rec_yh1_norm = jax.random.normal(ks[3], (B, 9, 8, 8), jnp.float32)
    yh2_norm = jax.random.normal(ks[4], (B, 9, 4, 4), jnp.float32)
    rec_yh2_norm = jax.random.normal(ks[5], (B, 9, 4, 4), jnp.float32)
    yl_norm = jax.random.normal(ks[6], (B, 3, 4, 4), jnp.float32)
    rec_yl_norm = jax.random.normal(ks[7], (B, 3, 4, 4), jnp.float32)
    yh1_ = jax.random.normal(ks[8], (B, 9, 8, 8), jnp.float32)
    rec_yh1_ = jax.random.normal(ks[9], (B, 9, 8, 8), jnp.float32)
    feat = jax.random.normal(ks[10], (B, 8, 4, 4), jnp.float32)
    vq_loss = jnp.float32(0.123)

    common = dict(imgs=imgs, yh1_norm=yh1_norm, yh2_norm=yh2_norm, yl_norm=yl_norm,
                  yh1_=yh1_, rec_imgs=rec_imgs, rec_yh1_norm=rec_yh1_norm,
                  rec_yh2_norm=rec_yh2_norm, rec_yl_norm=rec_yl_norm, rec_yh1_=rec_yh1_,
                  f=feat, vq_loss=vq_loss, last_layer=None, global_step=5, split="train")

    # config 1: focal reconstruction + hinge discriminator
    loss_a = PallasLoss(Args(rec_loss_fn="focal", disc_loss_fn="hinge"),
                        steps_per_epoch=10, img_shape=(B, C, H, W), key=ks[11])
    vae_loss_a, _ = loss_a.forward(optimizer_idx=0, **common)
    d_loss_a, _ = loss_a.forward(optimizer_idx=1, **common)

    # config 2: l2 reconstruction + cross-entropy discriminator
    loss_b = PallasLoss(Args(rec_loss_fn="l2", disc_loss_fn="cross_entropy"),
                        steps_per_epoch=10, img_shape=(B, C, H, W), key=ks[12])
    vae_loss_b, _ = loss_b.forward(optimizer_idx=0, **common)
    d_loss_b, _ = loss_b.forward(optimizer_idx=1, **common)

    # mmd_loss / compute_kernel (defined in the source module, exercised here)
    mmd = mmd_loss(feat, ks[13])

    for v in (vae_loss_a, d_loss_a, vae_loss_b, d_loss_b, mmd):
        jax.block_until_ready(v)
    print("KERNEL_OK")
</pallas_src>

<mosaic_0001>
module attributes {stable_mosaic.version = 11 : i64} {
  func.func @kernel(%arg0: i32, %arg1: memref<2x576xf32, #tpu.memory_space<vmem>>, %arg2: memref<2x576xf32, #tpu.memory_space<vmem>>, %arg3: memref<2x144xf32, #tpu.memory_space<vmem>>, %arg4: memref<2x144xf32, #tpu.memory_space<vmem>>, %arg5: memref<2x48xf32, #tpu.memory_space<vmem>>, %arg6: memref<2x48xf32, #tpu.memory_space<vmem>>, %arg7: memref<2x576xf32, #tpu.memory_space<vmem>>, %arg8: memref<2x576xf32, #tpu.memory_space<vmem>>, %arg9: memref<2x768xf32, #tpu.memory_space<vmem>>, %arg10: memref<2x768xf32, #tpu.memory_space<vmem>>, %arg11: memref<1x768xf32, #tpu.memory_space<vmem>>, %arg12: memref<1xf32, #tpu.memory_space<smem>>, %arg13: memref<1x8xf32, #tpu.memory_space<vmem>>, %arg14: memref<1x1xf32, #tpu.memory_space<vmem>>, %arg15: memref<1x1xf32, #tpu.memory_space<vmem>>, %arg16: memref<2x128xf32, #tpu.memory_space<vmem>>) attributes {dimension_semantics = [#tpu.dimension_semantics<arbitrary>], iteration_bounds = array<i64: 1>, scalar_prefetch = 0 : i64, scratch_operands = 3 : i64, tpu.core_type = #tpu.core_type<tc>, window_params = [{pipeline_mode = #tpu.pipeline_mode<synchronous>, transform_indices = @transform_0, window_bounds = array<i64: 2, 576>}, {pipeline_mode = #tpu.pipeline_mode<synchronous>, transform_indices = @transform_1, window_bounds = array<i64: 2, 576>}, {pipeline_mode = #tpu.pipeline_mode<synchronous>, transform_indices = @transform_2, window_bounds = array<i64: 2, 144>}, {pipeline_mode = #tpu.pipeline_mode<synchronous>, transform_indices = @transform_3, window_bounds = array<i64: 2, 144>}, {pipeline_mode = #tpu.pipeline_mode<synchronous>, transform_indices = @transform_4, window_bounds = array<i64: 2, 48>}, {pipeline_mode = #tpu.pipeline_mode<synchronous>, transform_indices = @transform_5, window_bounds = array<i64: 2, 48>}, {pipeline_mode = #tpu.pipeline_mode<synchronous>, transform_indices = @transform_6, window_bounds = array<i64: 2, 576>}, {pipeline_mode = #tpu.pipeline_mode<synchronous>, transform_indices = @transform_7, window_bounds = array<i64: 2, 576>}, {transform_indices = @transform_8, window_bounds = array<i64: 2, 768>}, {transform_indices = @transform_9, window_bounds = array<i64: 2, 768>}, {transform_indices = @transform_10, window_bounds = array<i64: 1, 768>}, {transform_indices = @transform_11, window_bounds = array<i64: 1>}, {pipeline_mode = #tpu.pipeline_mode<synchronous>, transform_indices = @transform_12, window_bounds = array<i64: 1, 8>}]} {
    %c0_i32 = arith.constant 0 : i32
    %0 = arith.cmpi eq, %arg0, %c0_i32 : i32
    %1 = arith.extui %0 : i1 to i32
    %c0_i32_0 = arith.constant 0 : i32
    %2 = arith.cmpi ne, %1, %c0_i32_0 : i32
    scf.if %2 {
      %cst_37 = arith.constant 0.000000e+00 : f32
      %46 = vector.broadcast %cst_37 : f32 to vector<1x1xf32>
      %c0_38 = arith.constant 0 : index
      %c0_39 = arith.constant 0 : index
      %47 = vector.load %arg15[%c0_38, %c0_39] : memref<1x1xf32, #tpu.memory_space<vmem>>, vector<1x1xf32>
      tpu.vector_store %arg15[%c0_38, %c0_39], %46 {strides = array<i32>} : memref<1x1xf32, #tpu.memory_space<vmem>>, vector<1x1xf32>,
      %cst_40 = arith.constant 0.000000e+00 : f32
      %48 = vector.broadcast %cst_40 : f32 to vector<2x128xf32>
      %c0_41 = arith.constant 0 : index
      %c0_42 = arith.constant 0 : index
      %49 = vector.load %arg16[%c0_41, %c0_42] : memref<2x128xf32, #tpu.memory_space<vmem>>, vector<2x128xf32>
      tpu.vector_store %arg16[%c0_41, %c0_42], %48 {strides = array<i32>} : memref<2x128xf32, #tpu.memory_space<vmem>>, vector<2x128xf32>,
      %c0_43 = arith.constant 0 : index
      %c0_44 = arith.constant 0 : index
      %50 = vector.load %arg1[%c0_43, %c0_44] : memref<2x576xf32, #tpu.memory_space<vmem>>, vector<2x576xf32>
      %c0_45 = arith.constant 0 : index
      %c0_46 = arith.constant 0 : index
      %51 = vector.load %arg2[%c0_45, %c0_46] : memref<2x576xf32, #tpu.memory_space<vmem>>, vector<2x576xf32>
      %52 = arith.subf %50, %51 : vector<2x576xf32>
      %53 = math.absf %52 : vector<2x576xf32>
      %cst_47 = arith.constant 1.000000e+00 : f32
      %54 = vector.broadcast %cst_47 : f32 to vector<2x576xf32>
      %55 = arith.minimumf %53, %54 : vector<2x576xf32>
      %56 = arith.mulf %52, %52 : vector<2x576xf32>
      %57 = arith.mulf %55, %56 : vector<2x576xf32>
      %58 = vector.shape_cast %57 : vector<2x576xf32> to vector<1x2x576xf32>
      %cst_48 = arith.constant dense<0.000000e+00> : vector<1xf32>
      %59 = vector.multi_reduction <add>, %58, %cst_48 [1, 2] : vector<1x2x576xf32> to vector<1xf32>
      %60 = vector.shape_cast %59 : vector<1xf32> to vector<1x1x1xf32>
      %61 = vector.extract %60[0, 0, 0] : f32 from vector<1x1x1xf32>
      %cst_49 = arith.constant 8.68055562E-4 : f32
      %62 = arith.mulf %61, %cst_49 : f32
      %cst_50 = arith.constant 0.000000e+00 : f32
      %63 = arith.addf %cst_50, %62 : f32
      %c0_51 = arith.constant 0 : index
      %c0_52 = arith.constant 0 : index
      %64 = vector.load %arg3[%c0_51, %c0_52] : memref<2x144xf32, #tpu.memory_space<vmem>>, vector<2x144xf32>
      %c0_53 = arith.constant 0 : index
      %c0_54 = arith.constant 0 : index
      %65 = vector.load %arg4[%c0_53, %c0_54] : memref<2x144xf32, #tpu.memory_space<vmem>>, vector<2x144xf32>
      %66 = arith.subf %64, %65 : vector<2x144xf32>
      %67 = math.absf %66 : vector<2x144xf32>
      %cst_55 = arith.constant 1.000000e+00 : f32
      %68 = vector.broadcast %cst_55 : f32 to vector<2x144xf32>
      %69 = arith.minimumf %67, %68 : vector<2x144xf32>
      %70 = arith.mulf %66, %66 : vector<2x144xf32>
      %71 = arith.mulf %69, %70 : vector<2x144xf32>
      %72 = vector.shape_cast %71 : vector<2x144xf32> to vector<1x2x144xf32>
      %cst_56 = arith.constant dense<0.000000e+00> : vector<1xf32>
      %73 = vector.multi_reduction <add>, %72, %cst_56 [1, 2] : vector<1x2x144xf32> to vector<1xf32>
      %74 = vector.shape_cast %73 : vector<1xf32> to vector<1x1x1xf32>
      %75 = vector.extract %74[0, 0, 0] : f32 from vector<1x1x1xf32>
      %cst_57 = arith.constant 0.00347222225 : f32
      %76 = arith.mulf %75, %cst_57 : f32
      %77 = arith.addf %63, %76 : f32
      %c0_58 = arith.constant 0 : index
      %c0_59 = arith.constant 0 : index
      %78 = vector.load %arg5[%c0_58, %c0_59] : memref<2x48xf32, #tpu.memory_space<vmem>>, vector<2x48xf32>
      %c0_60 = arith.constant 0 : index
      %c0_61 = arith.constant 0 : index
      %79 = vector.load %arg6[%c0_60, %c0_61] : memref<2x48xf32, #tpu.memory_space<vmem>>, vector<2x48xf32>
      %80 = arith.subf %78, %79 : vector<2x48xf32>
      %81 = math.absf %80 : vector<2x48xf32>
      %cst_62 = arith.constant 1.000000e+00 : f32
      %82 = vector.broadcast %cst_62 : f32 to vector<2x48xf32>
      %83 = arith.minimumf %81, %82 : vector<2x48xf32>
      %84 = arith.mulf %80, %80 : vector<2x48xf32>
      %85 = arith.mulf %83, %84 : vector<2x48xf32>
      %86 = vector.shape_cast %85 : vector<2x48xf32> to vector<1x2x48xf32>
      %cst_63 = arith.constant dense<0.000000e+00> : vector<1xf32>
      %87 = vector.multi_reduction <add>, %86, %cst_63 [1, 2] : vector<1x2x48xf32> to vector<1xf32>
      %88 = vector.shape_cast %87 : vector<1xf32> to vector<1x1x1xf32>
      %89 = vector.extract %88[0, 0, 0] : f32 from vector<1x1x1xf32>
      %cst_64 = arith.constant 0.010416667 : f32
      %90 = arith.mulf %89, %cst_64 : f32
      %91 = arith.addf %77, %90 : f32
      %c0_65 = arith.constant 0 : index
      %c0_66 = arith.constant 0 : index
      %92 = vector.load %arg7[%c0_65, %c0_66] : memref<2x576xf32, #tpu.memory_space<vmem>>, vector<2x576xf32>
      %c0_67 = arith.constant 0 : index
      %c0_68 = arith.constant 0 : index
      %93 = vector.load %arg8[%c0_67, %c0_68] : memref<2x576xf32, #tpu.memory_space<vmem>>, vector<2x576xf32>
      %94 = arith.subf %92, %93 : vector<2x576xf32>
      %95 = math.absf %94 : vector<2x576xf32>
      %cst_69 = arith.constant 1.000000e+00 : f32
      %96 = vector.broadcast %cst_69 : f32 to vector<2x576xf32>
      %97 = arith.minimumf %95, %96 : vector<2x576xf32>
      %98 = arith.mulf %94, %94 : vector<2x576xf32>
      %99 = arith.mulf %97, %98 : vector<2x576xf32>
      %100 = vector.shape_cast %99 : vector<2x576xf32> to vector<1x2x576xf32>
      %cst_70 = arith.constant dense<0.000000e+00> : vector<1xf32>
      %101 = vector.multi_reduction <add>, %100, %cst_70 [1, 2] : vector<1x2x576xf32> to vector<1xf32>
      %102 = vector.shape_cast %101 : vector<1xf32> to vector<1x1x1xf32>
      %103 = vector.extract %102[0, 0, 0] : f32 from vector<1x1x1xf32>
      %cst_71 = arith.constant 8.68055562E-4 : f32
      %104 = arith.mulf %103, %cst_71 : f32
      %105 = arith.addf %91, %104 : f32
      %106 = vector.broadcast %105 : f32 to vector<1x1xf32>
      %c0_72 = arith.constant 0 : index
      %c0_73 = arith.constant 0 : index
      %107 = vector.load %arg14[%c0_72, %c0_73] : memref<1x1xf32, #tpu.memory_space<vmem>>, vector<1x1xf32>
      tpu.vector_store %arg14[%c0_72, %c0_73], %106 {strides = array<i32>} : memref<1x1xf32, #tpu.memory_space<vmem>>, vector<1x1xf32>,
    } else {
    }
    %c0 = arith.constant 0 : index
    %c0_1 = arith.constant 0 : index
    %3 = vector.load %arg9[%c0, %c0_1] : memref<2x768xf32, #tpu.memory_space<vmem>>, vector<2x768xf32>
    %c0_2 = arith.constant 0 : index
    %c0_3 = arith.constant 0 : index
    %4 = vector.load %arg10[%c0_2, %c0_3] : memref<2x768xf32, #tpu.memory_space<vmem>>, vector<2x768xf32>
    %5 = arith.subf %3, %4 : vector<2x768xf32>
    %c0_4 = arith.constant 0 : index
    %c0_5 = arith.constant 0 : index
    %6 = vector.load %arg15[%c0_4, %c0_5] : memref<1x1xf32, #tpu.memory_space<vmem>>, vector<1x1xf32>
    %7 = arith.mulf %5, %5 : vector<2x768xf32>
    %8 = vector.shape_cast %7 : vector<2x768xf32> to vector<1x2x768xf32>
    %cst = arith.constant dense<0.000000e+00> : vector<1xf32>
    %9 = vector.multi_reduction <add>, %8, %cst [1, 2] : vector<1x2x768xf32> to vector<1xf32>
    %10 = vector.shape_cast %9 : vector<1xf32> to vector<1x1x1xf32>
    %11 = vector.extract %10[0, 0, 0] : f32 from vector<1x1x1xf32>
    %cst_6 = arith.constant 6.51041686E-4 : f32
    %12 = arith.mulf %11, %cst_6 : f32
    %13 = vector.broadcast %12 : f32 to vector<1x1xf32>
    %14 = arith.addf %6, %13 : vector<1x1xf32>
    %c0_7 = arith.constant 0 : index
    %c0_8 = arith.constant 0 : index
    %15 = vector.load %arg15[%c0_7, %c0_8] : memref<1x1xf32, #tpu.memory_space<vmem>>, vector<1x1xf32>
    tpu.vector_store %arg15[%c0_7, %c0_8], %14 {strides = array<i32>} : memref<1x1xf32, #tpu.memory_space<vmem>>, vector<1x1xf32>,
    %c0_9 = arith.constant 0 : index
    %c0_10 = arith.constant 0 : index
    %16 = vector.load %arg11[%c0_9, %c0_10] : memref<1x768xf32, #tpu.memory_space<vmem>>, vector<1x768xf32>
    %17 = vector.broadcast %16 : vector<1x768xf32> to vector<2x768xf32>
    %18 = arith.mulf %4, %17 : vector<2x768xf32>
    %c0_11 = arith.constant 0 : index
    %c0_12 = arith.constant 0 : index
    %19 = vector.load %arg16[%c0_11, %c0_12] : memref<2x128xf32, #tpu.memory_space<vmem>>, vector<2x128xf32>
    %20 = vector.extract_strided_slice %18 {offsets = [0, 0], sizes = [2, 128], strides = [1, 1]} : vector<2x768xf32> to vector<2x128xf32>
    %21 = arith.addf %19, %20 : vector<2x128xf32>
    %c0_13 = arith.constant 0 : index
    %c0_14 = arith.constant 0 : index
    %22 = vector.load %arg16[%c0_13, %c0_14] : memref<2x128xf32, #tpu.memory_space<vmem>>, vector<2x128xf32>
    tpu.vector_store %arg16[%c0_13, %c0_14], %21 {strides = array<i32>} : memref<2x128xf32, #tpu.memory_space<vmem>>, vector<2x128xf32>,
    %c0_15 = arith.constant 0 : index
    %c0_16 = arith.constant 0 : index
    %23 = vector.load %arg16[%c0_15, %c0_16] : memref<2x128xf32, #tpu.memory_space<vmem>>, vector<2x128xf32>
    %24 = vector.extract_strided_slice %18 {offsets = [0, 128], sizes = [2, 128], strides = [1, 1]} : vector<2x768xf32> to vector<2x128xf32>
    %25 = arith.addf %23, %24 : vector<2x128xf32>
    %c0_17 = arith.constant 0 : index
    %c0_18 = arith.constant 0 : index
    %26 = vector.load %arg16[%c0_17, %c0_18] : memref<2x128xf32, #tpu.memory_space<vmem>>, vector<2x128xf32>
    tpu.vector_store %arg16[%c0_17, %c0_18], %25 {strides = array<i32>} : memref<2x128xf32, #tpu.memory_space<vmem>>, vector<2x128xf32>,
    %c0_19 = arith.constant 0 : index
    %c0_20 = arith.constant 0 : index
    %27 = vector.load %arg16[%c0_19, %c0_20] : memref<2x128xf32, #tpu.memory_space<vmem>>, vector<2x128xf32>
    %28 = vector.extract_strided_slice %18 {offsets = [0, 256], sizes = [2, 128], strides = [1, 1]} : vector<2x768xf32> to vector<2x128xf32>
    %29 = arith.addf %27, %28 : vector<2x128xf32>
    %c0_21 = arith.constant 0 : index
    %c0_22 = arith.constant 0 : index
    %30 = vector.load %arg16[%c0_21, %c0_22] : memref<2x128xf32, #tpu.memory_space<vmem>>, vector<2x128xf32>
    tpu.vector_store %arg16[%c0_21, %c0_22], %29 {strides = array<i32>} : memref<2x128xf32, #tpu.memory_space<vmem>>, vector<2x128xf32>,
    %c0_23 = arith.constant 0 : index
    %c0_24 = arith.constant 0 : index
    %31 = vector.load %arg16[%c0_23, %c0_24] : memref<2x128xf32, #tpu.memory_space<vmem>>, vector<2x128xf32>
    %32 = vector.extract_strided_slice %18 {offsets = [0, 384], sizes = [2, 128], strides = [1, 1]} : vector<2x768xf32> to vector<2x128xf32>
    %33 = arith.addf %31, %32 : vector<2x128xf32>
    %c0_25 = arith.constant 0 : index
    %c0_26 = arith.constant 0 : index
    %34 = vector.load %arg16[%c0_25, %c0_26] : memref<2x128xf32, #tpu.memory_space<vmem>>, vector<2x128xf32>
    tpu.vector_store %arg16[%c0_25, %c0_26], %33 {strides = array<i32>} : memref<2x128xf32, #tpu.memory_space<vmem>>, vector<2x128xf32>,
    %c0_27 = arith.constant 0 : index
    %c0_28 = arith.constant 0 : index
    %35 = vector.load %arg16[%c0_27, %c0_28] : memref<2x128xf32, #tpu.memory_space<vmem>>, vector<2x128xf32>
    %36 = vector.extract_strided_slice %18 {offsets = [0, 512], sizes = [2, 128], strides = [1, 1]} : vector<2x768xf32> to vector<2x128xf32>
    %37 = arith.addf %35, %36 : vector<2x128xf32>
    %c0_29 = arith.constant 0 : index
    %c0_30 = arith.constant 0 : index
    %38 = vector.load %arg16[%c0_29, %c0_30] : memref<2x128xf32, #tpu.memory_space<vmem>>, vector<2x128xf32>
    tpu.vector_store %arg16[%c0_29, %c0_30], %37 {strides = array<i32>} : memref<2x128xf32, #tpu.memory_space<vmem>>, vector<2x128xf32>,
    %c0_31 = arith.constant 0 : index
    %c0_32 = arith.constant 0 : index
    %39 = vector.load %arg16[%c0_31, %c0_32] : memref<2x128xf32, #tpu.memory_space<vmem>>, vector<2x128xf32>
    %40 = vector.extract_strided_slice %18 {offsets = [0, 640], sizes = [2, 128], strides = [1, 1]} : vector<2x768xf32> to vector<2x128xf32>
    %41 = arith.addf %39, %40 : vector<2x128xf32>
    %c0_33 = arith.constant 0 : index
    %c0_34 = arith.constant 0 : index
    %42 = vector.load %arg16[%c0_33, %c0_34] : memref<2x128xf32, #tpu.memory_space<vmem>>, vector<2x128xf32>
    tpu.vector_store %arg16[%c0_33, %c0_34], %41 {strides = array<i32>} : memref<2x128xf32, #tpu.memory_space<vmem>>, vector<2x128xf32>,
    %c0_i32_35 = arith.constant 0 : i32
    %43 = arith.cmpi eq, %arg0, %c0_i32_35 : i32
    %44 = arith.extui %43 : i1 to i32
    %c0_i32_36 = arith.constant 0 : i32
    %45 = arith.cmpi ne, %44, %c0_i32_36 : i32
    scf.if %45 {
      %c0_37 = arith.constant 0 : index
      %c0_38 = arith.constant 0 : index
      %46 = vector.load %arg16[%c0_37, %c0_38] : memref<2x128xf32, #tpu.memory_space<vmem>>, vector<2x128xf32>
      %cst_39 = arith.constant dense<0.000000e+00> : vector<2xf32>
      %47 = vector.multi_reduction <add>, %46, %cst_39 [1] : vector<2x128xf32> to vector<2xf32>
      %48 = vector.shape_cast %47 : vector<2xf32> to vector<2x1xf32>
      %c0_40 = arith.constant 0 : index
      %49 = memref.load %arg12[%c0_40] : memref<1xf32, #tpu.memory_space<smem>>
      %50 = vector.broadcast %49 : f32 to vector<2x1xf32>
      %51 = arith.addf %48, %50 : vector<2x1xf32>
      %52 = vector.shape_cast %51 : vector<2x1xf32> to vector<1x2x1xf32>
      %cst_41 = arith.constant dense<0.000000e+00> : vector<1xf32>
      %53 = vector.multi_reduction <add>, %52, %cst_41 [1, 2] : vector<1x2x1xf32> to vector<1xf32>
      %54 = vector.shape_cast %53 : vector<1xf32> to vector<1x1x1xf32>
      %55 = vector.extract %54[0, 0, 0] : f32 from vector<1x1x1xf32>
      %cst_42 = arith.constant 2.000000e+00 : f32
      %56 = arith.divf %55, %cst_42 : f32
      %cst_43 = arith.constant 0.000000e+00 : f32
      %57 = arith.subf %cst_43, %56 : f32
      %cst_44 = arith.constant 0.000000e+00 : f32
      %58 = vector.broadcast %cst_44 : f32 to vector<1x8xf32>
      %c0_45 = arith.constant 0 : index
      %c0_46 = arith.constant 0 : index
      %59 = vector.load %arg13[%c0_45, %c0_46] : memref<1x8xf32, #tpu.memory_space<vmem>>, vector<1x8xf32>
      tpu.vector_store %arg13[%c0_45, %c0_46], %58 {strides = array<i32>} : memref<1x8xf32, #tpu.memory_space<vmem>>, vector<1x8xf32>,
      %c0_47 = arith.constant 0 : index
      %c0_48 = arith.constant 0 : index
      %60 = vector.load %arg14[%c0_47, %c0_48] : memref<1x1xf32, #tpu.memory_space<vmem>>, vector<1x1xf32>
      %c0_49 = arith.constant 0 : index
      %c0_50 = arith.constant 0 : index
      %61 = vector.load %arg13[%c0_49, %c0_50] : memref<1x8xf32, #tpu.memory_space<vmem>>, vector<1x1xf32>
      tpu.vector_store %arg13[%c0_49, %c0_50], %60 {strides = array<i32>} : memref<1x8xf32, #tpu.memory_space<vmem>>, vector<1x1xf32>,
      %c0_51 = arith.constant 0 : index
      %c0_52 = arith.constant 0 : index
      %62 = vector.load %arg15[%c0_51, %c0_52] : memref<1x1xf32, #tpu.memory_space<vmem>>, vector<1x1xf32>
      %c0_53 = arith.constant 0 : index
      %c1 = arith.constant 1 : index
      %63 = vector.load %arg13[%c0_53, %c1] : memref<1x8xf32, #tpu.memory_space<vmem>>, vector<1x1xf32>
      tpu.vector_store %arg13[%c0_53, %c1], %62 {strides = array<i32>} : memref<1x8xf32, #tpu.memory_space<vmem>>, vector<1x1xf32>,
      %64 = vector.broadcast %57 : f32 to vector<1x1xf32>
      %c0_54 = arith.constant 0 : index
      %c2 = arith.constant 2 : index
      %65 = vector.load %arg13[%c0_54, %c2] : memref<1x8xf32, #tpu.memory_space<vmem>>, vector<1x1xf32>
      tpu.vector_store %arg13[%c0_54, %c2], %64 {strides = array<i32>} : memref<1x8xf32, #tpu.memory_space<vmem>>, vector<1x1xf32>,
    } else {
    }
    return
  }
  func.func @transform_0(%arg0: i32) -> (i32, i32) {
    %c0_i32 = arith.constant 0 : i32
    %c0_i32_0 = arith.constant 0 : i32
    %c0_i32_1 = arith.constant 0 : i32
    return %c0_i32, %c0_i32_0 : i32, i32
  }
  func.func @transform_1(%arg0: i32) -> (i32, i32) {
    %c0_i32 = arith.constant 0 : i32
    %c0_i32_0 = arith.constant 0 : i32
    %c0_i32_1 = arith.constant 0 : i32
    return %c0_i32, %c0_i32_0 : i32, i32
  }
  func.func @transform_2(%arg0: i32) -> (i32, i32) {
    %c0_i32 = arith.constant 0 : i32
    %c0_i32_0 = arith.constant 0 : i32
    %c0_i32_1 = arith.constant 0 : i32
    return %c0_i32, %c0_i32_0 : i32, i32
  }
  func.func @transform_3(%arg0: i32) -> (i32, i32) {
    %c0_i32 = arith.constant 0 : i32
    %c0_i32_0 = arith.constant 0 : i32
    %c0_i32_1 = arith.constant 0 : i32
    return %c0_i32, %c0_i32_0 : i32, i32
  }
  func.func @transform_4(%arg0: i32) -> (i32, i32) {
    %c0_i32 = arith.constant 0 : i32
    %c0_i32_0 = arith.constant 0 : i32
    %c0_i32_1 = arith.constant 0 : i32
    return %c0_i32, %c0_i32_0 : i32, i32
  }
  func.func @transform_5(%arg0: i32) -> (i32, i32) {
    %c0_i32 = arith.constant 0 : i32
    %c0_i32_0 = arith.constant 0 : i32
    %c0_i32_1 = arith.constant 0 : i32
    return %c0_i32, %c0_i32_0 : i32, i32
  }
  func.func @transform_6(%arg0: i32) -> (i32, i32) {
    %c0_i32 = arith.constant 0 : i32
    %c0_i32_0 = arith.constant 0 : i32
    %c0_i32_1 = arith.constant 0 : i32
    return %c0_i32, %c0_i32_0 : i32, i32
  }
  func.func @transform_7(%arg0: i32) -> (i32, i32) {
    %c0_i32 = arith.constant 0 : i32
    %c0_i32_0 = arith.constant 0 : i32
    %c0_i32_1 = arith.constant 0 : i32
    return %c0_i32, %c0_i32_0 : i32, i32
  }
  func.func @transform_8(%arg0: i32) -> (i32, i32) {
    %c0_i32 = arith.constant 0 : i32
    %c0_i32_0 = arith.constant 0 : i32
    return %c0_i32, %arg0 : i32, i32
  }
  func.func @transform_9(%arg0: i32) -> (i32, i32) {
    %c0_i32 = arith.constant 0 : i32
    %c0_i32_0 = arith.constant 0 : i32
    return %c0_i32, %arg0 : i32, i32
  }
  func.func @transform_10(%arg0: i32) -> (i32, i32) {
    %c0_i32 = arith.constant 0 : i32
    %c0_i32_0 = arith.constant 0 : i32
    return %c0_i32, %arg0 : i32, i32
  }
  func.func @transform_11(%arg0: i32) -> i32 {
    %c0_i32 = arith.constant 0 : i32
    %c0_i32_0 = arith.constant 0 : i32
    return %c0_i32 : i32
  }
  func.func @transform_12(%arg0: i32) -> (i32, i32) {
    %c0_i32 = arith.constant 0 : i32
    %c0_i32_0 = arith.constant 0 : i32
    %c0_i32_1 = arith.constant 0 : i32
    return %c0_i32, %c0_i32_0 : i32, i32
  }
}

</mosaic_0001>

<bundles_post_ra>
// kernel: tpu_custom_call.1
= control target key start
LH: loop header
LB: loop body
LE: loop exit
PB: predicated region body
PF: predicated region fallthrough
CT: control target
= control target key end

     0   :  { %18 = vsyncpa [#allocation7], 0  ;;  %s1060_s0 = inlined_call_operand.hbm [shape: f32[2,576], index: 0, kind: input, shape index: {}]   ;;  %s1061_s1 = inlined_call_operand.hbm [shape: f32[2,576], index: 1, kind: input, shape index: {}]   ;;  %s1062_s2 = inlined_call_operand.hbm [shape: f32[2,144], index: 2, kind: input, shape index: {}]   ;;  %s1063_s3 = inlined_call_operand.hbm [shape: f32[2,144], index: 3, kind: input, shape index: {}]   ;;  %s1064_s4 = inlined_call_operand.hbm [shape: f32[2,48], index: 4, kind: input, shape index: {}]   ;;  %s1065_s5 = inlined_call_operand.hbm [shape: f32[2,48], index: 5, kind: input, shape index: {}]   ;;  %s1066_s6 = inlined_call_operand.hbm [shape: f32[2,576], index: 6, kind: input, shape index: {}]   ;;  %s1067_s7 = inlined_call_operand.hbm [shape: f32[2,576], index: 7, kind: input, shape index: {}]   ;;  %s1068_s8 = inlined_call_operand.vmem [shape: f32[2,768], index: 8, kind: input, shape index: {}]   ;;  %s1069_s9 = inlined_call_operand.vmem [shape: f32[2,768], index: 9, kind: input, shape index: {}]   ;;  %s1070_s10 = inlined_call_operand.vmem [shape: f32[1,768], index: 10, kind: input, shape index: {}]   ;;  %s1071_s11 = inlined_call_operand.<no memory space> [shape: f32[1], index: 11, kind: input, shape index: {}]   ;;  %s1072_s12 = inlined_call_operand.hbm [shape: f32[1,8], index: 12, kind: output, shape index: {}]  }
   0x1   :  { %19 = vsyncpa [#allocation10], 0 }
   0x2   :  { %20 = vsyncpa [#allocation13], 0 }
   0x3   :  { %21 = vsyncpa [#allocation16], 0 }
   0x4   :  { %22 = vsyncpa [#allocation19], 0 }
   0x5   :  { %23 = vsyncpa [#allocation8], 0  ;;  %s799_s21 = smov [#allocation9]   ;;  %s800_s23 = smov [#allocation12]  }
   0x6   :  { %s40_s22 = sshll.u32 %s799_s21, 4  ;;  %s60_s24 = sshll.u32 %s800_s23, 4  ;;  %s41_s22 = int_to_ptr.vmem [resolvable:$true] %s40_s22  ;;  %s61_s24 = int_to_ptr.vmem [resolvable:$true] %s60_s24 }
   0x7   :  { %s589_s27 = scalar_lea.hbm %s1061_s1, 160 }
   0x8   :  { %p590_p0 = scmp.ne.s32.totalorder %s1061_s1, %s589_s27  ;;  %p593_p1 = scmp.lt.u32.totalorder %s589_s27, %s1061_s1 }
   0xa   :  { %p595_p2 = pnand %p593_p1, %p590_p0 }
   0xc   :  { %598 = shalt.err (!%p595_p2)
}
   0xd   :  { %s599_s14 = scalar_lea.vmem %s41_s22, 160  ;;  %p604_p4 = scmp.lt.s32.totalorder %s41_s22, %s41_s22 }
   0xe   :  { %p600_p3 = scmp.ne.s32.totalorder %s41_s22, %s599_s14  ;;  %p605_p5 = scmp.lt.s32.totalorder %s599_s14, %s599_s14 }
  0x10   :  { %p606_p6 = por %p605_p5, %p604_p4 }
  0x12   :  { %p607_p7 = pnand %p606_p6, %p600_p3 }
  0x14   :  { %610 = shalt.err (!%p607_p7)
}
  0x15   :  { %43 = dma.hbm_to_vmem [thread:$0]  %s1061_s1, 160, %s41_s22, [#allocation10]  }
  0x16   :  { %s611_s19 = scalar_lea.hbm %s1063_s3, 64 }
  0x17   :  { %p612_p8 = scmp.ne.s32.totalorder %s1063_s3, %s611_s19  ;;  %p615_p9 = scmp.lt.u32.totalorder %s611_s19, %s1063_s3 }
  0x19   :  { %p617_p10 = pnand %p615_p9, %p612_p8 }
  0x1b   :  { %620 = shalt.err (!%p617_p10)
}
  0x1c   :  { %s621_s26 = scalar_lea.vmem %s61_s24, 64  ;;  %p626_p12 = scmp.lt.s32.totalorder %s61_s24, %s61_s24 }
  0x1d   :  { %p622_p11 = scmp.ne.s32.totalorder %s61_s24, %s621_s26  ;;  %p627_p13 = scmp.lt.s32.totalorder %s621_s26, %s621_s26 }
  0x1f   :  { %p628_p0 = por %p627_p13, %p626_p12 }
  0x21   :  { %p629_p1 = pnand %p628_p0, %p622_p11 }
  0x23   :  { %632 = shalt.err (!%p629_p1)
}
  0x24   :  { %63 = dma.hbm_to_vmem [thread:$0]  %s1063_s3, 64, %s61_s24, [#allocation13]  }
  0x25   :  { %s801_s27 = smov [#allocation15]   ;;  %s802_s29 = smov [#allocation6]  }
  0x26   :  { %s80_s28 = sshll.u32 %s801_s27, 4  ;;  %s30_s30 = sshll.u32 %s802_s29, 4  ;;  %s81_s28 = int_to_ptr.vmem [resolvable:$true] %s80_s28  ;;  %s31_s30 = int_to_ptr.vmem [resolvable:$true] %s30_s30 }
  0x27   :  { %s633_s15 = scalar_lea.hbm %s1065_s5, 32 }
  0x28   :  { %p634_p2 = scmp.ne.s32.totalorder %s1065_s5, %s633_s15  ;;  %p637_p3 = scmp.lt.u32.totalorder %s633_s15, %s1065_s5 }
  0x2a   :  { %p639_p4 = pnand %p637_p3, %p634_p2 }
  0x2c   :  { %642 = shalt.err (!%p639_p4)
}
  0x2d   :  { %s643_s3 = scalar_lea.vmem %s81_s28, 32  ;;  %p648_p6 = scmp.lt.s32.totalorder %s81_s28, %s81_s28 }
  0x2e   :  { %p644_p5 = scmp.ne.s32.totalorder %s81_s28, %s643_s3  ;;  %p649_p7 = scmp.lt.s32.totalorder %s643_s3, %s643_s3 }
  0x30   :  { %p650_p8 = por %p649_p7, %p648_p6 }
  0x32   :  { %p651_p9 = pnand %p650_p8, %p644_p5 }
  0x34   :  { %654 = shalt.err (!%p651_p9)
}
  0x35   :  { %83 = dma.hbm_to_vmem [thread:$0]  %s1065_s5, 32, %s81_s28, [#allocation16]  }
  0x36   :  { %s655_s25 = scalar_lea.hbm %s1060_s0, 160 }
  0x37   :  { %p656_p10 = scmp.ne.s32.totalorder %s1060_s0, %s655_s25  ;;  %p659_p11 = scmp.lt.u32.totalorder %s655_s25, %s1060_s0 }
  0x39   :  { %p661_p12 = pnand %p659_p11, %p656_p10 }
  0x3b   :  { %664 = shalt.err (!%p661_p12)
}
  0x3c   :  { %s665_s29 = scalar_lea.vmem %s31_s30, 160  ;;  %p670_p0 = scmp.lt.s32.totalorder %s31_s30, %s31_s30 }
  0x3d   :  { %p666_p13 = scmp.ne.s32.totalorder %s31_s30, %s665_s29  ;;  %p671_p1 = scmp.lt.s32.totalorder %s665_s29, %s665_s29 }
  0x3f   :  { %p672_p2 = por %p671_p1, %p670_p0 }
  0x41   :  { %p673_p3 = pnand %p672_p2, %p666_p13 }
  0x43   :  { %676 = shalt.err (!%p673_p3)
}
  0x44   :  { %33 = dma.hbm_to_vmem [thread:$0]  %s1060_s0, 160, %s31_s30, [#allocation7]  }
  0x45   :  { %s803_s13 = smov [#allocation11]   ;;  %s804_s15 = smov [#allocation14]  }
  0x46   :  { %s50_s14 = sshll.u32 %s803_s13, 4  ;;  %s70_s16 = sshll.u32 %s804_s15, 4  ;;  %s51_s14 = int_to_ptr.vmem [resolvable:$true] %s50_s14  ;;  %s71_s16 = int_to_ptr.vmem [resolvable:$true] %s70_s16 }
  0x47   :  { %s677_s19 = scalar_lea.hbm %s1062_s2, 64 }
  0x48   :  { %p678_p4 = scmp.ne.s32.totalorder %s1062_s2, %s677_s19  ;;  %p681_p5 = scmp.lt.u32.totalorder %s677_s19, %s1062_s2 }
  0x4a   :  { %p683_p6 = pnand %p681_p5, %p678_p4 }
  0x4c   :  { %686 = shalt.err (!%p683_p6)
}
  0x4d   :  { %s687_s0 = scalar_lea.vmem %s51_s14, 64  ;;  %p692_p8 = scmp.lt.s32.totalorder %s51_s14, %s51_s14 }
  0x4e   :  { %p688_p7 = scmp.ne.s32.totalorder %s51_s14, %s687_s0  ;;  %p693_p9 = scmp.lt.s32.totalorder %s687_s0, %s687_s0 }
  0x50   :  { %p694_p10 = por %p693_p9, %p692_p8 }
  0x52   :  { %p695_p11 = pnand %p694_p10, %p688_p7 }
  0x54   :  { %698 = shalt.err (!%p695_p11)
}
  0x55   :  { %53 = dma.hbm_to_vmem [thread:$0]  %s1062_s2, 64, %s51_s14, [#allocation10]  }
  0x56   :  { %s699_s1 = scalar_lea.hbm %s1064_s4, 32 }
  0x57   :  { %p700_p12 = scmp.ne.s32.totalorder %s1064_s4, %s699_s1  ;;  %p703_p13 = scmp.lt.u32.totalorder %s699_s1, %s1064_s4 }
  0x59   :  { %p705_p0 = pnand %p703_p13, %p700_p12 }
  0x5b   :  { %708 = shalt.err (!%p705_p0)
}
  0x5c   :  { %s709_s28 = scalar_lea.vmem %s71_s16, 32  ;;  %p714_p2 = scmp.lt.s32.totalorder %s71_s16, %s71_s16 }
  0x5d   :  { %p710_p1 = scmp.ne.s32.totalorder %s71_s16, %s709_s28  ;;  %p715_p3 = scmp.lt.s32.totalorder %s709_s28, %s709_s28 }
  0x5f   :  { %p716_p4 = por %p715_p3, %p714_p2 }
  0x61   :  { %p717_p5 = pnand %p716_p4, %p710_p1 }
  0x63   :  { %720 = shalt.err (!%p717_p5)
}
  0x64   :  { %73 = dma.hbm_to_vmem [thread:$0]  %s1064_s4, 32, %s71_s16, [#allocation13]  }
  0x65   :  { %s805_s14 = smov [#allocation17]   ;;  %s806_s17 = smov [#allocation18]  }
  0x66   :  { %s90_s15 = sshll.u32 %s805_s14, 4  ;;  %s100_s18 = sshll.u32 %s806_s17, 4  ;;  %s91_s15 = int_to_ptr.vmem [resolvable:$true] %s90_s15  ;;  %s101_s18 = int_to_ptr.vmem [resolvable:$true] %s100_s18 }
  0x67   :  { %s721_s24 = scalar_lea.hbm %s1066_s6, 160 }
  0x68   :  { %p722_p6 = scmp.ne.s32.totalorder %s1066_s6, %s721_s24  ;;  %p725_p7 = scmp.lt.u32.totalorder %s721_s24, %s1066_s6 }
  0x6a   :  { %p727_p8 = pnand %p725_p7, %p722_p6 }
  0x6c   :  { %730 = shalt.err (!%p727_p8)
}
  0x6d   :  { %s731_s4 = scalar_lea.vmem %s91_s15, 160  ;;  %p736_p10 = scmp.lt.s32.totalorder %s91_s15, %s91_s15 }
  0x6e   :  { %p732_p9 = scmp.ne.s32.totalorder %s91_s15, %s731_s4  ;;  %p737_p11 = scmp.lt.s32.totalorder %s731_s4, %s731_s4 }
  0x70   :  { %p738_p12 = por %p737_p11, %p736_p10 }
  0x72   :  { %p739_p13 = pnand %p738_p12, %p732_p9 }
  0x74   :  { %742 = shalt.err (!%p739_p13)
}
  0x75   :  { %93 = dma.hbm_to_vmem [thread:$0]  %s1066_s6, 160, %s91_s15, [#allocation16]  }
  0x76   :  { %s743_s1 = scalar_lea.hbm %s1067_s7, 160 }
  0x77   :  { %p744_p0 = scmp.ne.s32.totalorder %s1067_s7, %s743_s1  ;;  %p747_p1 = scmp.lt.u32.totalorder %s743_s1, %s1067_s7 }
  0x79   :  { %p749_p2 = pnand %p747_p1, %p744_p0 }
  0x7b   :  { %752 = shalt.err (!%p749_p2)
}
  0x7c   :  { %s753_s28 = scalar_lea.vmem %s101_s18, 160  ;;  %p758_p4 = scmp.lt.s32.totalorder %s101_s18, %s101_s18 }
  0x7d   :  { %p754_p3 = scmp.ne.s32.totalorder %s101_s18, %s753_s28  ;;  %p759_p5 = scmp.lt.s32.totalorder %s753_s28, %s753_s28 }
  0x7f   :  { %p760_p6 = por %p759_p5, %p758_p4 }
  0x81   :  { %p761_p7 = pnand %p760_p6, %p754_p3 }
  0x83   :  { %764 = shalt.err (!%p761_p7)
}
  0x84   :  { %103 = dma.hbm_to_vmem [thread:$0]  %s1067_s7, 160, %s101_s18, [#allocation19]  }
  0x85   :  { %787 = dma.done.wait [#allocation7], 160  }
  0x86   :  { %788 = vsyncadd [#allocation7], 4294967136 }
  0x87   :  { %789 = dma.done.wait [#allocation10], 224  }
  0x88   :  { %790 = vsyncadd [#allocation10], 4294967072 }
  0x89   :  { %791 = dma.done.wait [#allocation13], 96  }
  0x8a   :  { %792 = vsyncadd [#allocation13], 4294967200 }
  0x8b   :  { %793 = dma.done.wait [#allocation16], 192  }
  0x8c   :  { %794 = vsyncadd [#allocation16], 4294967104 }
  0x8d   :  { %795 = dma.done.wait [#allocation19], 160  }
  0x8e   :  { %796 = vsyncadd [#allocation19], 4294967136  ;;  %v163_v0 = vlaneseq  ;;  %v807_v1 = vmov 0.0   ;;  %v808_v2 = vmov 1983009808   ;;  %v332_v27 = vld [vmem:[%s1069_s9] sm:$0xff] }
  0x8f   :  { %142 = vst [vmem:[#allocation4] sm:$0x3] %v807_v1  ;;  %v161_v3 = vunpack.c.l.s4 %v808_v2  ;;  %v985_v11 = vld [vmem:[%s1070_s10] sm:$0x3f]  ;;  %v210_v16 = vld [vmem:[#allocation11] sm:$0xf] }
  0x90   :  { %v973_v4 = vshrl.u32 %v163_v0, 7  ;;  %v211_v17 = vld [vmem:[#allocation12] sm:$0xf]  ;;  %v243_v23 = vld [vmem:[#allocation14] sm:$0x3]  ;;  %vm188_vm0 = vcmask 1041408  }
  0x91   :  { %v162_v5 = vunpack.c.0.s8 %v161_v3  ;;  %v212_v18 = vsub.f32 %v210_v16, %v211_v17  ;;  %v244_v24 = vld [vmem:[#allocation15] sm:$0x3]  ;;  %vm229_vm1 = vcmask 123904   ;;  %vm250_vm2 = vcmask 386048   ;;  %v331_v46 = vld [vmem:[%s1068_s8 + $0x8] sm:$0xf] }
  0x92   :  { %v402_v6 = vsub.s32 0, %v973_v4  ;;  %v406_v7 = vsub.s32 1, %v973_v4  ;;  %v410_v8 = vsub.s32 2, %v973_v4  ;;  %v414_v9 = vsub.s32 3, %v973_v4  ;;  %v330_v44 = vld [vmem:[%s1068_s8] sm:$0xff]  ;;  %s809_s29 = smov 1  }
  0x93   :  { %v980_v10 = vsub.s32 %v162_v5, %v973_v4  ;;  %v213_v21 = vand.u32 2147483647, %v212_v18  ;;  %v215_v22 = vmul.f32 %v212_v18, %v212_v18  ;;  %v245_v30 = vsub.f32 %v243_v23, %v244_v24  ;;  %v333_v48 = vld [vmem:[%s1069_s9 + $0x8] sm:$0xf]  ;;  %v265_v23 = vld [vmem:[#allocation18] sm:$0xff]  ;;  %s810_s6 = smov [#allocation20]  }
  0x94   :  { %v403_v12 = vrot.slane %v985_v11, %v402_v6  ;;  %v407_v13 = vrot.slane %v985_v11, %v406_v7  ;;  %v411_v14 = vrot.slane %v985_v11, %v410_v8  ;;  %v415_v15 = vrot.slane %v985_v11, %v414_v9  ;;  %s551_s2 = sshll.u32 %s810_s6, 4  ;;  %s552_s2 = int_to_ptr.vmem [resolvable:$true] %s551_s2 }
  0x95   :  { %v214_v28 = vmin.f32 %v213_v21, 1.0  ;;  %v246_v35 = vand.u32 2147483647, %v245_v30  ;;  %v248_v39 = vmul.f32 %v245_v30, %v245_v30  ;;  %v334_v50 = vsub.f32 %v330_v44, %v332_v27  ;;  %v266_v44 = vld [vmem:[#allocation18 + $0x8] sm:$0x3]  ;;  %s765_s13 = scalar_lea.vmem %s552_s2, 16  ;;  %p770_p9 = scmp.lt.s32.totalorder %s552_s2, %s552_s2 }
  0x96   :  { %v424_v19 = vcombine.low %v403_v12, %v407_v13  ;;  %v425_v20 = vcombine.low %v411_v14, %v415_v15  ;;  %v453_v31 = vld [vmem:[#allocation4] sm:$0x3]  ;;  %v335_v51 = vsub.f32 %v331_v46, %v333_v48  ;;  %v143_v12 = vld [vmem:[#allocation6] sm:$0xff]  ;;  %v145_v13 = vld [vmem:[#allocation9] sm:$0xff]  ;;  %v418_v15 = vsub.s32 4, %v973_v4  ;;  %p766_p8 = scmp.ne.s32.totalorder %s552_s2, %s765_s13  ;;  %s769_s10 = scalar_lea.vmem %s552_s2, 32 }
  0x97   :  { %v216_v32 = vmul.f32 %v215_v22, %v214_v28  ;;  %v247_v42 = vmin.f32 %v246_v35, 1.0  ;;  %v337_v53 = vmul.f32 %v334_v50, %v334_v50  ;;  %v422_v16 = vsub.s32 5, %v973_v4  ;;  %v263_v22 = vld [vmem:[#allocation17] sm:$0xff]  ;;  %p771_p10 = scmp.lt.s32.totalorder %s769_s10, %s765_s13 }
  0x98   :  { %v432_v25 = vrot.slane %v424_v19, %v980_v10  ;;  %v439_v26 = vrot.slane %v425_v20, %v980_v10  ;;  %v338_v55 = vmul.f32 %v335_v51, %v335_v51  ;;  %v147_v20 = vsub.f32 %v143_v12, %v145_v13 }
  0x99   :  { %v224_v34 = vrot.slane %v216_v32, %v980_v10  ;;  %v249_v45 = vmul.f32 %v248_v39, %v247_v42  ;;  %v341_v56 = vcombine.high %v337_v53, %v337_v53  ;;  %v348_v57 = vrot.slane %v337_v53, %v980_v10  ;;  %p772_p11 = por %p771_p10, %p770_p9 }
  0x9a   :  { %v440_v29 = vcombine.low %v432_v25, %v439_v26  ;;  %v364_v61 = vrot.slane %v338_v55, %v980_v10  ;;  %v419_v24 = vrot.slane %v985_v11, %v418_v15  ;;  %v423_v25 = vrot.slane %v985_v11, %v422_v16 }
  0x9b   :  { %v225_v37 = vcombine.high %v224_v34, %v224_v34  ;;  %v228_v38 = vsel %vm188_vm0, %v224_v34, 0.0  ;;  %v251_v49 = vsel %vm250_vm2, %v249_v45, 0.0  ;;  %v355_v59 = vrot.slane %v341_v56, %v980_v10  ;;  %p773_p12 = pnand %p772_p11, %p766_p8 }
  0x9c   :  { %v451_v33 = vmul.f32 %v440_v29, %v332_v27  ;;  %v356_v60 = vcombine.high %v348_v57, %v348_v57  ;;  %v373_v62 = vsel %vm188_vm0, %v348_v57, 0.0  ;;  %v365_v6 = vcombine.high %v364_v61, %v364_v61 }
  0x9d   :  { %v230_v41 = vsel %vm229_vm1, %v225_v37, 0.0  ;;  %v357_v63 = vcombine.high %v355_v59, %v355_v59  ;;  %v376_v5 = vsel %vm188_vm0, %v355_v59, 0.0  ;;  %v380_v14 = vsel %vm188_vm0, %v364_v61, 0.0  ;;  %v146_v37 = vld [vmem:[#allocation9 + $0x8] sm:$0x3] }
  0x9e   :  { %v454_v36 = vadd.f32 %v453_v31, %v451_v33  ;;  %v464_v40 = vrot.slane %v451_v33, %v980_v10  ;;  %v231_v43 = vadd.f32 %v230_v41, %v228_v38  ;;  %v470_v58 = vcombine.high %v451_v33, %v451_v33 }
  0x9f   :  { %v374_v0 = vsel %vm188_vm0, %v356_v60, 0.0  ;;  %v378_v7 = vsel %vm188_vm0, %v357_v63, 0.0  ;;  %v382_v19 = vsel %vm188_vm0, %v365_v6, 0.0  ;;  %v149_v28 = vand.u32 2147483647, %v147_v20 }
  0xa0   :  { %455 = vst [vmem:[#allocation4] sm:$0x3] %v454_v36  ;;  %v465_v47 = vcombine.high %v464_v40, %v464_v40  ;;  %232 = vadd.xlane.f32.xlu1 %v231_v43  ;;  %v477_v2 = vrot.slane %v470_v58, %v980_v10  ;;  %v375_v3 = vadd.f32 %v374_v0, %v373_v62  ;;  %v144_v36 = vld [vmem:[#allocation6 + $0x8] sm:$0x3]  ;;  %vm196_vm3 = vcmask 517120  }
  0xa1   :  { %v267_v29 = vsub.f32 %v263_v22, %v265_v23  ;;  %v441_v30 = vcombine.low %v419_v24, %v423_v25  ;;  %v151_v32 = vmin.f32 %v149_v28, 1.0  ;;  %v153_v33 = vmul.f32 %v147_v20, %v147_v20  ;;  %v264_v43 = vld [vmem:[#allocation17 + $0x8] sm:$0x3] }
  0xa2   :  { %v377_v8 = vadd.f32 %v376_v5, %v375_v3  ;;  %v482_v27 = vcombine.high %v477_v2, %v477_v2  ;;  %v148_v41 = vsub.f32 %v144_v36, %v146_v37  ;;  %vm140_vm4 = vcmask 0  }
  0xa3   :  { %v269_v34 = vand.u32 2147483647, %v267_v29  ;;  %v448_v35 = vrot.slane %v441_v30, %v980_v10  ;;  %v155_v38 = vmul.f32 %v153_v33, %v151_v32  ;;  %v273_v40 = vmul.f32 %v267_v29, %v267_v29  ;;  %141 = vst.msk [vmem:[#allocation3] sm:$0x1] %vm140_vm4, %v807_v1 }
  0xa4   :  { %252 = vadd.xlane.f32.xlu1 %v251_v49  ;;  %v379_v18 = vadd.f32 %v378_v7, %v377_v8  ;;  %v150_v49 = vand.u32 2147483647, %v148_v41  ;;  %v154_v56 = vmul.f32 %v148_v41, %v148_v41  ;;  %vm527_vm5 = vcmask 57344  }
  0xa5   :  { %v271_v39 = vmin.f32 %v269_v34, 1.0  ;;  %v452_v11 = vmul.f32 %v448_v35, %v333_v48  ;;  %v166_v42 = vrot.slane %v155_v38, %v980_v10  ;;  %v159_v50 = vcombine.high %v155_v38, %v155_v38  ;;  %528 = vst.msk [vmem:[#allocation20] sm:$0x1] %vm527_vm5, %v807_v1 }
  0xa6   :  { %v381_v21 = vadd.f32 %v380_v14, %v379_v18  ;;  %v152_v55 = vmin.f32 %v150_v49, 1.0  ;;  %v510_v35 = vstv %s1071_s11  ;;  %vm512_vm6 = vcmask 1024  }
  0xa7   :  { %v456_v52 = vld [vmem:[#allocation4] sm:$0x3]  ;;  %v275_v45 = vmul.f32 %v273_v40, %v271_v39  ;;  %v497_v51 = vrot.slane %v452_v11, %v980_v10  ;;  %v174_v53 = vcombine.high %v166_v42, %v166_v42  ;;  %v173_v48 = vrot.slane %v159_v50, %v980_v10 }
  0xa8   :  { %v467_v54 = vadd.f32 %v465_v47, %v456_v52  ;;  %v383_v26 = vadd.f32 %v382_v19, %v381_v21  ;;  %v268_v52 = vsub.f32 %v264_v43, %v266_v44  ;;  %v189_v59 = vsel %vm188_vm0, %v166_v42, 0.0 }
  0xa9   :  { %v498_v57 = vcombine.high %v497_v51, %v497_v51  ;;  %v190_v60 = vsel %vm188_vm0, %v174_v53, 0.0  ;;  %v279_v61 = vcombine.high %v275_v45, %v275_v45  ;;  %v156_v63 = vmul.f32 %v154_v56, %v152_v55 }
  0xaa   :  { %468 = vst [vmem:[#allocation4] sm:$0x3] %v467_v54  ;;  %384 = vadd.xlane.f32.xlu1 %v383_v26  ;;  %v286_v54 = vrot.slane %v275_v45, %v980_v10  ;;  %v270_v58 = vand.u32 2147483647, %v268_v52  ;;  %v175_v0 = vcombine.high %v173_v48, %v173_v48  ;;  %v191_v3 = vadd.f32 %v190_v60, %v189_v59 }
  0xab   :  { %v192_v5 = vsel %vm188_vm0, %v173_v48, 0.0  ;;  %v274_v7 = vmul.f32 %v268_v52, %v268_v52  ;;  %v182_v14 = vrot.slane %v156_v63, %v980_v10  ;;  %vm540_vm7 = vcmask 8200  }
  0xac   :  { %v294_v62 = vcombine.high %v286_v54, %v286_v54  ;;  %v272_v6 = vmin.f32 %v270_v58, 1.0  ;;  %v308_v12 = vsel %vm188_vm0, %v286_v54, 0.0  ;;  %v193_v15 = vadd.f32 %v192_v5, %v191_v3  ;;  %v336_v5 = vld [vmem:[#allocation3] sm:$0x1] }
  0xad   :  { %v197_v23 = vsel %vm196_vm3, %v182_v14, 0.0  ;;  %vm543_vm8 = vcmask 16400  }
  0xae   :  { %v309_v13 = vsel %vm188_vm0, %v294_v62, 0.0  ;;  %v276_v18 = vmul.f32 %v274_v7, %v272_v6 }
  0xaf   :  { %v310_v16 = vadd.f32 %v309_v13, %v308_v12 }
  0xb0   :  { %v302_v24 = vrot.slane %v276_v18, %v980_v10 }
  0xb1   :  { %v469_v9 = vld [vmem:[#allocation4] sm:$0x3] }
  0xb2   :  { %v479_v17 = vadd.f32 %v477_v2, %v469_v9  ;;  %v293_v9 = vrot.slane %v279_v61, %v980_v10  ;;  %v315_v30 = vsel %vm196_vm3, %v302_v24, 0.0 }
  0xb4   :  { %480 = vst [vmem:[#allocation4] sm:$0x3] %v479_v17  ;;  %v194_v17 = vsel %vm188_vm0, %v175_v0, 0.0  ;;  %v295_v19 = vcombine.high %v293_v9, %v293_v9  ;;  %v311_v20 = vsel %vm188_vm0, %v293_v9, 0.0 }
  0xb5   :  { %v195_v21 = vadd.f32 %v194_v17, %v193_v15  ;;  %v312_v22 = vadd.f32 %v311_v20, %v310_v16 }
  0xb6   :  { %v313_v25 = vsel %vm188_vm0, %v295_v19, 0.0 }
  0xb7   :  { %v198_v28 = vadd.f32 %v197_v23, %v195_v21  ;;  %v314_v29 = vadd.f32 %v313_v25, %v312_v22 }
  0xbb   :  { %v481_v4 = vld [vmem:[#allocation4] sm:$0x3] }
  0xbc   :  { %v484_v31 = vadd.f32 %v482_v27, %v481_v4  ;;  %v316_v4 = vadd.f32 %v315_v30, %v314_v29 }
  0xbe   :  { %485 = vst [vmem:[#allocation4] sm:$0x3] %v484_v31 }
  0xc5   :  { %v486_v46 = vld [vmem:[#allocation4] sm:$0x3] }
  0xc6   :  { %v487_v47 = vadd.f32 %v486_v46, %v452_v11 }
  0xc8   :  { %488 = vst [vmem:[#allocation4] sm:$0x3] %v487_v47 }
  0xcf   :  { %v489_v2 = vld [vmem:[#allocation4] sm:$0x3] }
  0xd0   :  { %v500_v8 = vadd.f32 %v498_v57, %v489_v2 }
  0xd2   :  { %501 = vst [vmem:[#allocation4] sm:$0x3] %v500_v8 }
  0xd9   :  { %v505_v26 = vld [vmem:[#allocation4] sm:$0x3] }
  0xda   :  { %v506_v27 = vsel %vm188_vm0, %v505_v26, 0.0 }
  0xdb   :  { %507 = vadd.xlane.f32.xlu0 %v506_v27 }
  0xdf   :  { %199 = vadd.xlane.f32.xlu0 %v198_v28 }
  0xe3   :  { %317 = vadd.xlane.f32.xlu0 %v316_v4 }
 0x12d   :  { %v233_v10 = vpop.xlane.xlu1 %232 }
 0x12e   :  { %v234_v32 = vrot.slane %v233_v10, 4 }
 0x130   :  { %v235_v36 = vadd.f32 %v234_v32, %v233_v10 }
 0x131   :  { %v253_v31 = vpop.xlane.xlu1 %252 }
 0x132   :  { %v254_v33 = vrot.slane %v253_v31, 4  ;;  %v236_v11 = vrot.slane %v235_v36, 2 }
 0x134   :  { %v255_v38 = vadd.f32 %v254_v33, %v253_v31  ;;  %v237_v46 = vadd.f32 %v236_v11, %v235_v36 }
 0x136   :  { %v256_v43 = vrot.slane %v255_v38, 2  ;;  %v238_v53 = vrot.slane %v237_v46, 1 }
 0x137   :  { %v385_v34 = vpop.xlane.xlu1 %384 }
 0x138   :  { %v386_v37 = vrot.slane %v385_v34, 4  ;;  %v257_v49 = vadd.f32 %v256_v43, %v255_v38  ;;  %v239_v59 = vadd.f32 %v238_v53, %v237_v46 }
 0x13a   :  { %v387_v41 = vadd.f32 %v386_v37, %v385_v34  ;;  %v258_v48 = vrot.slane %v257_v49, 1 }
 0x13c   :  { %v388_v45 = vrot.slane %v387_v41, 2  ;;  %v259_v62 = vadd.f32 %v258_v48, %v257_v49 }
 0x13e   :  { %v389_v54 = vadd.f32 %v388_v45, %v387_v41 }
 0x140   :  { %v390_v60 = vrot.slane %v389_v54, 1 }
 0x142   :  { %v391_v2 = vadd.f32 %v390_v60, %v389_v54 }
 0x168   :  { %v508_v39 = vpop.xlane.xlu0 %507 }
 0x169   :  { %v511_v40 = vadd.f32 %v510_v35, %v508_v39 }
 0x16b   :  { %v513_v42 = vsel %vm512_vm6, %v511_v40, 0.0 }
 0x16c   :  { %514 = vadd.xlane.f32.xlu0 %v513_v42  ;;  %v200_v1 = vpop.xlane.xlu0 %199 }
 0x16d   :  { %v201_v44 = vrot.slane %v200_v1, 4 }
 0x16f   :  { %v202_v47 = vadd.f32 %v201_v44, %v200_v1 }
 0x170   :  { %v318_v50 = vpop.xlane.xlu0 %317 }
 0x171   :  { %v203_v51 = vrot.slane %v202_v47, 2  ;;  %v319_v52 = vrot.slane %v318_v50, 4 }
 0x173   :  { %v320_v55 = vadd.f32 %v319_v52, %v318_v50  ;;  %v204_v56 = vadd.f32 %v203_v51, %v202_v47 }
 0x175   :  { %v321_v57 = vrot.slane %v320_v55, 2  ;;  %v205_v58 = vrot.slane %v204_v56, 1 }
 0x177   :  { %v206_v61 = vadd.f32 %v205_v58, %v204_v56  ;;  %v322_v63 = vadd.f32 %v321_v57, %v320_v55 }
 0x179   :  { %565 = vpush %v206_v61  ;;  %v323_v0 = vrot.slane %v322_v63, 1 }
 0x17a   :  { %567 = vpush %v239_v59 }
 0x17b   :  { %569 = vpush %v259_v62  ;;  %v324_v3 = vadd.f32 %v323_v0, %v322_v63 }
 0x17d   :  { %571 = vpush %v324_v3 }
 0x17e   :  { %573 = vpush %v391_v2 }
 0x1aa   :  { %s566_s11 = spop %565 }
 0x1ab   :  { %s208_s20 = smul.f32 0.00086805556, %s566_s11  ;;  %s568_s21 = spop %567 }
 0x1ac   :  { %s241_s0 = smul.f32 0.0034722222, %s568_s21  ;;  %s570_s30 = spop %569 }
 0x1ad   :  { %s261_s4 = smul.f32 0.010416667, %s570_s30 }
 0x1ae   :  { %s242_s16 = sadd.f32 %s241_s0, %s208_s20  ;;  %s572_s23 = spop %571 }
 0x1af   :  { %s326_s25 = smul.f32 0.00086805556, %s572_s23  ;;  %s574_s26 = spop %573 }
 0x1b0   :  { %s262_s1 = sadd.f32 %s261_s4, %s242_s16  ;;  %s393_s22 = smul.f32 0.0006510417, %s574_s26 }
 0x1b2   :  { %s327_s27 = sadd.f32 %s326_s25, %s262_s1  ;;  %v394_v6 = vstv %s393_s22 }
 0x1b3   :  { %v395_v7 = vadd.f32 %v394_v6, %v336_v5 }
 0x1b4   :  { %v328_v8 = vstv %s327_s27 }
 0x1b5   :  { %329 = vst.msk [vmem:[#allocation2] sm:$0x1] %vm140_vm4, %v328_v8  ;;  %397 = vst.msk [vmem:[#allocation3] sm:$0x1] %vm140_vm4, %v395_v7 }
 0x1bc   :  { %v564_v9 = vld [vmem:[#allocation3] ss:$0 sm:$0xff]  ;;  %v529_v12 = vld [vmem:[#allocation2] sm:$0x1] }
 0x1bd   :  { %537 = vrot.lane.b32.xlu1 %v564_v9, %s809_s29  ;;  %530 = vst.msk [vmem:[#allocation20] sm:$0x1] %vm140_vm4, %v529_v12 }
 0x1f9   :  { %v515_v13 = vpop.xlane.xlu0 %514 }
 0x1fa   :  { %v516_v14 = vrot.slane %v515_v13, 4 }
 0x1fc   :  { %v517_v15 = vadd.f32 %v516_v14, %v515_v13 }
 0x1fe   :  { %v518_v16 = vrot.slane %v517_v15, 2 }
 0x200   :  { %v519_v17 = vadd.f32 %v518_v16, %v517_v15 }
 0x202   :  { %v520_v18 = vrot.slane %v519_v17, 1 }
 0x204   :  { %v521_v19 = vadd.f32 %v520_v18, %v519_v17 }
 0x206   :  { %575 = vpush %v521_v19 }
 0x22f   :  { %v538_v20 = vpop.permute.xlu1 %537 }
 0x230   :  { %541 = vst.msk [vmem:[#allocation20] sm:$0x1] %vm540_vm7, %v538_v20 }
 0x237   :  { %s576_s5 = spop %575 }
 0x238   :  { %s525_s28 = smul.f32 0.5, %s576_s5 }
 0x23a   :  { %s526_s7 = ssub.f32 0.0, %s525_s28 }
 0x23c   :  { %v542_v21 = vstv %s526_s7 }
 0x23d   :  { %544 = vst.msk [vmem:[#allocation20] sm:$0x1] %vm543_vm8, %v542_v21 }
 0x23e   :  { %776 = shalt.err (!%p773_p12)
}
 0x23f   :  { %s777_s17 = scalar_lea.hbm %s1072_s12, 16 }
 0x240   :  { %p778_p13 = scmp.ne.s32.totalorder %s1072_s12, %s777_s17  ;;  %p781_p0 = scmp.lt.u32.totalorder %s777_s17, %s1072_s12 }
 0x242   :  { %p783_p1 = pnand %p781_p0, %p778_p13 }
 0x244   :  { %786 = shalt.err (!%p783_p1)
}
 0x245   :  { %554 = dma.vmem_to_hbm [thread:$0]  %s552_s2, 16, %s1072_s12, [#allocation8]  }
 0x246   :  { %797 = dma.done.wait [#allocation8], 16  }
 0x247   :  { %798 = vsyncadd [#allocation8], 4294967280 }
 0x248   :  { %558 = vsyncpa [#allocation7], 1 }
 0x249   :  { %559 = vsyncpa [#allocation10], 1 }
 0x24a   :  { %560 = vsyncpa [#allocation13], 1 }
 0x24b   :  { %561 = vsyncpa [#allocation16], 1 }
 0x24c   :  { %562 = vsyncpa [#allocation19], 1 }
 0x24d   :  { %563 = vsyncpa [#allocation8], 1 }

</bundles_post_ra>
